<compile_context>
chip_gen: v7x
topology: tpu7x:2x2x1
jax: 0.10.0
libtpu: 0.0.40
codegen_flags: <defaults>
</compile_context>

<pallas_src>
import functools

import jax
import jax.numpy as jnp
from jax.experimental import pallas as pl
from jax.experimental.pallas import tpu as pltpu


def _gate_conv1d_kernel(x_ref, w_ref, b_ref, o_ref, x_pad_ref, *, K, dilation,
                        stride, pad, L, L_out, C_out, mxu_dtype):
    # x_ref:     (NB, C_in, L)        batch tile, NCL (length on lanes)
    # w_ref:     (K, 2*C_out, C_in)   tap-major weights
    # b_ref:     (2*C_out, 1)         bias (lane-broadcastable column)
    # o_ref:     (NB, C_out, L_out)   gated output, NCL
    # x_pad_ref: (NB, C_in, L_pad)    VMEM scratch with zero halo columns
    NB, C_in, _ = x_ref.shape

    if pad > 0:
        # Zero only the halo columns, then drop the input tile in the middle.
        edge = jnp.zeros((NB, C_in, pad), x_pad_ref.dtype)
        x_pad_ref[:, :, :pad] = edge
        x_pad_ref[:, :, pad + L:] = edge
        x_pad_ref[:, :, pad:pad + L] = x_ref[...]
        src = x_pad_ref
    else:
        src = x_ref

    # Hoist weight loads / casts out of the batch and tap loops.
    w_taps = [w_ref[k].astype(mxu_dtype) for k in range(K)]  # K x (2*C_out, C_in)
    b = b_ref[...]                                           # (2*C_out, 1), f32

    for n in range(NB):                      # NB is tiny -> fully unrolled
        x_n = src[n]                         # (C_in, L_pad) loaded once per n
        acc = jnp.zeros((2 * C_out, L_out), jnp.float32)
        for k in range(K):                   # K accumulated tap matmuls
            start = k * dilation
            if stride == 1:
                xs = x_n[:, start:start + L_out]             # (C_in, L_out)
            else:
                # stride>1 is not the shipped config; value-strided slice is
                # correct.  # TODO(synk): for real stride>1 configs, load
                # strided from the ref (pl.ds(..., stride=)) instead.
                span = (L_out - 1) * stride + 1
                xs = x_n[:, start:start + span:stride]
            acc = acc + jnp.dot(w_taps[k], xs.astype(mxu_dtype),
                                preferred_element_type=jnp.float32)
        y = acc + b                                          # (2*C_out, L_out)
        main = y[:C_out, :]
        gate = y[C_out:, :]
        o_ref[n] = (main * jax.nn.sigmoid(gate)).astype(o_ref.dtype)


def gate_conv1d(x_ncl, weight, bias, *, dilation=1, pad=0, stride=1,
                mxu_dtype=jnp.float32):
    """Forward pass of GateConv1D with PyTorch-compatible layouts.

    x_ncl:  (N, C_in, L)        float32  (NCL)
    weight: (2*C_out, C_in, K)  float32  (nn.Conv1d weight layout)
    bias:   (2*C_out,)          float32
    returns (N, C_out, L_out)   float32  (NCL)
    """
    N, C_in, L = x_ncl.shape
    two_co, c_in_w, K = weight.shape
    assert c_in_w == C_in
    C_out = two_co // 2

    L_pad = L + 2 * pad
    L_out = (L_pad - dilation * (K - 1) - 1) // stride + 1
    assert L_out > 0, "output length must be positive"

    # One-time tiny parameter re-layout (not an activation HBM pass):
    #   w_taps[k, o, c] = weight[o, c, k]; bias as a lane-broadcastable column.
    w_taps = jnp.transpose(weight, (2, 0, 1))
    b_col = bias.reshape(two_co, 1)

    # Whole (small) batch per grid step.  For large N / long L, tile NB and/or
    # add a parallel L_out-tile grid axis with a dilation*(K-1) halo so v7x's
    # two TensorCores both get work and blocks fit its 64 MiB VMEM.
    NB = N
    grid = (N // NB,)

    kernel = functools.partial(
        _gate_conv1d_kernel, K=K, dilation=dilation, stride=stride, pad=pad,
        L=L, L_out=L_out, C_out=C_out, mxu_dtype=mxu_dtype)

    return pl.pallas_call(
        kernel,
        out_shape=jax.ShapeDtypeStruct((N, C_out, L_out), x_ncl.dtype),
        grid_spec=pltpu.PrefetchScalarGridSpec(
            num_scalar_prefetch=0,
            grid=grid,
            in_specs=[
                pl.BlockSpec((NB, C_in, L), lambda b: (b, 0, 0)),
                pl.BlockSpec((K, two_co, C_in), lambda b: (0, 0, 0)),
                pl.BlockSpec((two_co, 1), lambda b: (0, 0)),
            ],
            out_specs=pl.BlockSpec((NB, C_out, L_out), lambda b: (b, 0, 0)),
            scratch_shapes=[pltpu.VMEM((NB, C_in, L_pad), x_ncl.dtype)],
        ),
        compiler_params=pltpu.CompilerParams(
            dimension_semantics=("parallel",)),
    )(x_ncl, w_taps, b_col)


def _reference(x_ncl, weight, bias, *, dilation, pad, stride):
    """Pure-JAX reference (lax conv) mirroring the PyTorch forward."""
    y = jax.lax.conv_general_dilated(
        x_ncl, weight,
        window_strides=(stride,),
        padding=[(pad, pad)],
        rhs_dilation=(dilation,),
        dimension_numbers=("NCH", "OIH", "NCH"),
    ) + bias[None, :, None]
    c = y.shape[1] // 2
    main, gate = y[:, :c, :], y[:, c:, :]
    return main * jax.nn.sigmoid(gate)


if __name__ == "__main__":
    # Module config: GateConv1D(in_channels=4, out_channels=8, dilation=2, pad=4, s=1)
    in_channels, out_channels = 4, 8
    dilation, pad, stride, K = 2, 4, 1, 5
    N, L = 2, 16

    key = jax.random.PRNGKey(0)
    kx, kw, kb = jax.random.split(key, 3)

    x = jax.random.normal(kx, (N, in_channels, L), dtype=jnp.float32)
    # Deterministic synthetic parameters (shapes match nn.Conv1d(in, 2*out, 5)).
    fan_in = in_channels * K
    bound = 1.0 / (fan_in ** 0.5)
    weight = jax.random.uniform(kw, (2 * out_channels, in_channels, K),
                                dtype=jnp.float32, minval=-bound, maxval=bound)
    bias = jax.random.uniform(kb, (2 * out_channels,), dtype=jnp.float32,
                              minval=-bound, maxval=bound)

    out = gate_conv1d(x, weight, bias, dilation=dilation, pad=pad, stride=stride)
    out = jax.block_until_ready(out)

    ref = _reference(x, weight, bias, dilation=dilation, pad=pad, stride=stride)
    assert out.shape == ref.shape, (out.shape, ref.shape)
    assert jnp.allclose(out, ref, rtol=1e-4, atol=1e-4), "mismatch vs reference"

    print("KERNEL_OK")
</pallas_src>

<mosaic_0001>
module attributes {stable_mosaic.version = 11 : i64} {
  func.func @_gate_conv1d_kernel(%arg0: i32, %arg1: memref<2x4x16xf32, #tpu.memory_space<vmem>>, %arg2: memref<5x16x4xf32, #tpu.memory_space<vmem>>, %arg3: memref<16x1xf32, #tpu.memory_space<vmem>>, %arg4: memref<2x8x16xf32, #tpu.memory_space<vmem>>, %arg5: memref<2x4x24xf32, #tpu.memory_space<vmem>>) attributes {dimension_semantics = [#tpu.dimension_semantics<parallel>], iteration_bounds = array<i64: 1>, scalar_prefetch = 0 : i64, scratch_operands = 1 : i64, tpu.core_type = #tpu.core_type<tc>, window_params = [{transform_indices = @transform_0, window_bounds = array<i64: 2, 4, 16>}, {pipeline_mode = #tpu.pipeline_mode<synchronous>, transform_indices = @transform_1, window_bounds = array<i64: 5, 16, 4>}, {pipeline_mode = #tpu.pipeline_mode<synchronous>, transform_indices = @transform_2, window_bounds = array<i64: 16, 1>}, {transform_indices = @transform_3, window_bounds = array<i64: 2, 8, 16>}]} {
    %cst = arith.constant 0.000000e+00 : f32
    %0 = vector.broadcast %cst : f32 to vector<2x4x4xf32>
    %c0 = arith.constant 0 : index
    %c0_0 = arith.constant 0 : index
    %c0_1 = arith.constant 0 : index
    %1 = vector.load %arg5[%c0, %c0_0, %c0_1] : memref<2x4x24xf32, #tpu.memory_space<vmem>>, vector<2x4x4xf32>
    tpu.vector_store %arg5[%c0, %c0_0, %c0_1], %0 {strides = array<i32>} : memref<2x4x24xf32, #tpu.memory_space<vmem>>, vector<2x4x4xf32>,
    %c0_2 = arith.constant 0 : index
    %c0_3 = arith.constant 0 : index
    %c20 = arith.constant 20 : index
    %2 = vector.load %arg5[%c0_2, %c0_3, %c20] : memref<2x4x24xf32, #tpu.memory_space<vmem>>, vector<2x4x4xf32>
    tpu.vector_store %arg5[%c0_2, %c0_3, %c20], %0 {strides = array<i32>} : memref<2x4x24xf32, #tpu.memory_space<vmem>>, vector<2x4x4xf32>,
    %c0_4 = arith.constant 0 : index
    %c0_5 = arith.constant 0 : index
    %c0_6 = arith.constant 0 : index
    %3 = vector.load %arg1[%c0_4, %c0_5, %c0_6] : memref<2x4x16xf32, #tpu.memory_space<vmem>>, vector<2x4x16xf32>
    %c0_7 = arith.constant 0 : index
    %c0_8 = arith.constant 0 : index
    %c4 = arith.constant 4 : index
    %4 = vector.load %arg5[%c0_7, %c0_8, %c4] : memref<2x4x24xf32, #tpu.memory_space<vmem>>, vector<2x4x16xf32>
    tpu.vector_store %arg5[%c0_7, %c0_8, %c4], %3 {strides = array<i32>} : memref<2x4x24xf32, #tpu.memory_space<vmem>>, vector<2x4x16xf32>,
    %c0_9 = arith.constant 0 : index
    %c0_10 = arith.constant 0 : index
    %c0_11 = arith.constant 0 : index
    %5 = vector.load %arg2[%c0_9, %c0_10, %c0_11] : memref<5x16x4xf32, #tpu.memory_space<vmem>>, vector<1x16x4xf32>
    %6 = vector.shape_cast %5 : vector<1x16x4xf32> to vector<16x4xf32>
    %c1 = arith.constant 1 : index
    %c0_12 = arith.constant 0 : index
    %c0_13 = arith.constant 0 : index
    %7 = vector.load %arg2[%c1, %c0_12, %c0_13] : memref<5x16x4xf32, #tpu.memory_space<vmem>>, vector<1x16x4xf32>
    %8 = vector.shape_cast %7 : vector<1x16x4xf32> to vector<16x4xf32>
    %c2 = arith.constant 2 : index
    %c0_14 = arith.constant 0 : index
    %c0_15 = arith.constant 0 : index
    %9 = vector.load %arg2[%c2, %c0_14, %c0_15] : memref<5x16x4xf32, #tpu.memory_space<vmem>>, vector<1x16x4xf32>
    %10 = vector.shape_cast %9 : vector<1x16x4xf32> to vector<16x4xf32>
    %c3 = arith.constant 3 : index
    %c0_16 = arith.constant 0 : index
    %c0_17 = arith.constant 0 : index
    %11 = vector.load %arg2[%c3, %c0_16, %c0_17] : memref<5x16x4xf32, #tpu.memory_space<vmem>>, vector<1x16x4xf32>
    %12 = vector.shape_cast %11 : vector<1x16x4xf32> to vector<16x4xf32>
    %c4_18 = arith.constant 4 : index
    %c0_19 = arith.constant 0 : index
    %c0_20 = arith.constant 0 : index
    %13 = vector.load %arg2[%c4_18, %c0_19, %c0_20] : memref<5x16x4xf32, #tpu.memory_space<vmem>>, vector<1x16x4xf32>
    %14 = vector.shape_cast %13 : vector<1x16x4xf32> to vector<16x4xf32>
    %c0_21 = arith.constant 0 : index
    %c0_22 = arith.constant 0 : index
    %15 = vector.load %arg3[%c0_21, %c0_22] : memref<16x1xf32, #tpu.memory_space<vmem>>, vector<16x1xf32>
    %c0_23 = arith.constant 0 : index
    %c0_24 = arith.constant 0 : index
    %c0_25 = arith.constant 0 : index
    %16 = vector.load %arg5[%c0_23, %c0_24, %c0_25] : memref<2x4x24xf32, #tpu.memory_space<vmem>>, vector<1x4x24xf32>
    %17 = vector.shape_cast %16 : vector<1x4x24xf32> to vector<4x24xf32>
    %cst_26 = arith.constant 0.000000e+00 : f32
    %18 = vector.broadcast %cst_26 : f32 to vector<16x16xf32>
    %19 = vector.extract_strided_slice %17 {offsets = [0, 0], sizes = [4, 16], strides = [1, 1]} : vector<4x24xf32> to vector<4x16xf32>
    %cst_27 = arith.constant dense<0.000000e+00> : vector<16x16xf32>
    %20 = tpu.matmul %6, %19, %cst_27 {dimension_numbers = #tpu.dot_dimension_numbers<[1], [0], [0], [1], [0, 0, 1, 1], [], []>} : vector<16x4xf32>, vector<4x16xf32>, vector<16x16xf32> -> vector<16x16xf32>
    %21 = arith.addf %18, %20 : vector<16x16xf32>
    %22 = vector.extract_strided_slice %17 {offsets = [0, 2], sizes = [4, 16], strides = [1, 1]} : vector<4x24xf32> to vector<4x16xf32>
    %cst_28 = arith.constant dense<0.000000e+00> : vector<16x16xf32>
    %23 = tpu.matmul %8, %22, %cst_28 {dimension_numbers = #tpu.dot_dimension_numbers<[1], [0], [0], [1], [0, 0, 1, 1], [], []>} : vector<16x4xf32>, vector<4x16xf32>, vector<16x16xf32> -> vector<16x16xf32>
    %24 = arith.addf %21, %23 : vector<16x16xf32>
    %25 = vector.extract_strided_slice %17 {offsets = [0, 4], sizes = [4, 16], strides = [1, 1]} : vector<4x24xf32> to vector<4x16xf32>
    %cst_29 = arith.constant dense<0.000000e+00> : vector<16x16xf32>
    %26 = tpu.matmul %10, %25, %cst_29 {dimension_numbers = #tpu.dot_dimension_numbers<[1], [0], [0], [1], [0, 0, 1, 1], [], []>} : vector<16x4xf32>, vector<4x16xf32>, vector<16x16xf32> -> vector<16x16xf32>
    %27 = arith.addf %24, %26 : vector<16x16xf32>
    %28 = vector.extract_strided_slice %17 {offsets = [0, 6], sizes = [4, 16], strides = [1, 1]} : vector<4x24xf32> to vector<4x16xf32>
    %cst_30 = arith.constant dense<0.000000e+00> : vector<16x16xf32>
    %29 = tpu.matmul %12, %28, %cst_30 {dimension_numbers = #tpu.dot_dimension_numbers<[1], [0], [0], [1], [0, 0, 1, 1], [], []>} : vector<16x4xf32>, vector<4x16xf32>, vector<16x16xf32> -> vector<16x16xf32>
    %30 = arith.addf %27, %29 : vector<16x16xf32>
    %31 = vector.extract_strided_slice %17 {offsets = [0, 8], sizes = [4, 16], strides = [1, 1]} : vector<4x24xf32> to vector<4x16xf32>
    %cst_31 = arith.constant dense<0.000000e+00> : vector<16x16xf32>
    %32 = tpu.matmul %14, %31, %cst_31 {dimension_numbers = #tpu.dot_dimension_numbers<[1], [0], [0], [1], [0, 0, 1, 1], [], []>} : vector<16x4xf32>, vector<4x16xf32>, vector<16x16xf32> -> vector<16x16xf32>
    %33 = arith.addf %30, %32 : vector<16x16xf32>
    %34 = vector.broadcast %15 : vector<16x1xf32> to vector<16x16xf32>
    %35 = arith.addf %33, %34 : vector<16x16xf32>
    %36 = vector.extract_strided_slice %35 {offsets = [0, 0], sizes = [8, 16], strides = [1, 1]} : vector<16x16xf32> to vector<8x16xf32>
    %37 = vector.extract_strided_slice %35 {offsets = [8, 0], sizes = [8, 16], strides = [1, 1]} : vector<16x16xf32> to vector<8x16xf32>
    %38 = arith.negf %37 : vector<8x16xf32>
    %39 = math.exp %38 : vector<8x16xf32>
    %cst_32 = arith.constant 1.000000e+00 : f32
    %40 = vector.broadcast %cst_32 : f32 to vector<8x16xf32>
    %41 = arith.addf %40, %39 : vector<8x16xf32>
    %42 = arith.divf %40, %41 : vector<8x16xf32>
    %43 = arith.mulf %36, %42 : vector<8x16xf32>
    %c0_33 = arith.constant 0 : index
    %c0_34 = arith.constant 0 : index
    %c0_35 = arith.constant 0 : index
    %44 = vector.load %arg4[%c0_33, %c0_34, %c0_35] : memref<2x8x16xf32, #tpu.memory_space<vmem>>, vector<1x8x16xf32>
    %45 = vector.shape_cast %44 : vector<1x8x16xf32> to vector<8x16xf32>
    %46 = vector.shape_cast %43 : vector<8x16xf32> to vector<1x8x16xf32>
    tpu.vector_store %arg4[%c0_33, %c0_34, %c0_35], %46 {strides = array<i32>} : memref<2x8x16xf32, #tpu.memory_space<vmem>>, vector<1x8x16xf32>,
    %c1_36 = arith.constant 1 : index
    %c0_37 = arith.constant 0 : index
    %c0_38 = arith.constant 0 : index
    %47 = vector.load %arg5[%c1_36, %c0_37, %c0_38] : memref<2x4x24xf32, #tpu.memory_space<vmem>>, vector<1x4x24xf32>
    %48 = vector.shape_cast %47 : vector<1x4x24xf32> to vector<4x24xf32>
    %cst_39 = arith.constant 0.000000e+00 : f32
    %49 = vector.broadcast %cst_39 : f32 to vector<16x16xf32>
    %50 = vector.extract_strided_slice %48 {offsets = [0, 0], sizes = [4, 16], strides = [1, 1]} : vector<4x24xf32> to vector<4x16xf32>
    %cst_40 = arith.constant dense<0.000000e+00> : vector<16x16xf32>
    %51 = tpu.matmul %6, %50, %cst_40 {dimension_numbers = #tpu.dot_dimension_numbers<[1], [0], [0], [1], [0, 0, 1, 1], [], []>} : vector<16x4xf32>, vector<4x16xf32>, vector<16x16xf32> -> vector<16x16xf32>
    %52 = arith.addf %49, %51 : vector<16x16xf32>
    %53 = vector.extract_strided_slice %48 {offsets = [0, 2], sizes = [4, 16], strides = [1, 1]} : vector<4x24xf32> to vector<4x16xf32>
    %cst_41 = arith.constant dense<0.000000e+00> : vector<16x16xf32>
    %54 = tpu.matmul %8, %53, %cst_41 {dimension_numbers = #tpu.dot_dimension_numbers<[1], [0], [0], [1], [0, 0, 1, 1], [], []>} : vector<16x4xf32>, vector<4x16xf32>, vector<16x16xf32> -> vector<16x16xf32>
    %55 = arith.addf %52, %54 : vector<16x16xf32>
    %56 = vector.extract_strided_slice %48 {offsets = [0, 4], sizes = [4, 16], strides = [1, 1]} : vector<4x24xf32> to vector<4x16xf32>
    %cst_42 = arith.constant dense<0.000000e+00> : vector<16x16xf32>
    %57 = tpu.matmul %10, %56, %cst_42 {dimension_numbers = #tpu.dot_dimension_numbers<[1], [0], [0], [1], [0, 0, 1, 1], [], []>} : vector<16x4xf32>, vector<4x16xf32>, vector<16x16xf32> -> vector<16x16xf32>
    %58 = arith.addf %55, %57 : vector<16x16xf32>
    %59 = vector.extract_strided_slice %48 {offsets = [0, 6], sizes = [4, 16], strides = [1, 1]} : vector<4x24xf32> to vector<4x16xf32>
    %cst_43 = arith.constant dense<0.000000e+00> : vector<16x16xf32>
    %60 = tpu.matmul %12, %59, %cst_43 {dimension_numbers = #tpu.dot_dimension_numbers<[1], [0], [0], [1], [0, 0, 1, 1], [], []>} : vector<16x4xf32>, vector<4x16xf32>, vector<16x16xf32> -> vector<16x16xf32>
    %61 = arith.addf %58, %60 : vector<16x16xf32>
    %62 = vector.extract_strided_slice %48 {offsets = [0, 8], sizes = [4, 16], strides = [1, 1]} : vector<4x24xf32> to vector<4x16xf32>
    %cst_44 = arith.constant dense<0.000000e+00> : vector<16x16xf32>
    %63 = tpu.matmul %14, %62, %cst_44 {dimension_numbers = #tpu.dot_dimension_numbers<[1], [0], [0], [1], [0, 0, 1, 1], [], []>} : vector<16x4xf32>, vector<4x16xf32>, vector<16x16xf32> -> vector<16x16xf32>
    %64 = arith.addf %61, %63 : vector<16x16xf32>
    %65 = vector.broadcast %15 : vector<16x1xf32> to vector<16x16xf32>
    %66 = arith.addf %64, %65 : vector<16x16xf32>
    %67 = vector.extract_strided_slice %66 {offsets = [0, 0], sizes = [8, 16], strides = [1, 1]} : vector<16x16xf32> to vector<8x16xf32>
    %68 = vector.extract_strided_slice %66 {offsets = [8, 0], sizes = [8, 16], strides = [1, 1]} : vector<16x16xf32> to vector<8x16xf32>
    %69 = arith.negf %68 : vector<8x16xf32>
    %70 = math.exp %69 : vector<8x16xf32>
    %cst_45 = arith.constant 1.000000e+00 : f32
    %71 = vector.broadcast %cst_45 : f32 to vector<8x16xf32>
    %72 = arith.addf %71, %70 : vector<8x16xf32>
    %73 = arith.divf %71, %72 : vector<8x16xf32>
    %74 = arith.mulf %67, %73 : vector<8x16xf32>
    %c1_46 = arith.constant 1 : index
    %c0_47 = arith.constant 0 : index
    %c0_48 = arith.constant 0 : index
    %75 = vector.load %arg4[%c1_46, %c0_47, %c0_48] : memref<2x8x16xf32, #tpu.memory_space<vmem>>, vector<1x8x16xf32>
    %76 = vector.shape_cast %75 : vector<1x8x16xf32> to vector<8x16xf32>
    %77 = vector.shape_cast %74 : vector<8x16xf32> to vector<1x8x16xf32>
    tpu.vector_store %arg4[%c1_46, %c0_47, %c0_48], %77 {strides = array<i32>} : memref<2x8x16xf32, #tpu.memory_space<vmem>>, vector<1x8x16xf32>,
    return
  }
  func.func @transform_0(%arg0: i32) -> (i32, i32, i32) {
    %c0_i32 = arith.constant 0 : i32
    %c0_i32_0 = arith.constant 0 : i32
    %c0_i32_1 = arith.constant 0 : i32
    return %arg0, %c0_i32, %c0_i32_0 : i32, i32, i32
  }
  func.func @transform_1(%arg0: i32) -> (i32, i32, i32) {
    %c0_i32 = arith.constant 0 : i32
    %c0_i32_0 = arith.constant 0 : i32
    %c0_i32_1 = arith.constant 0 : i32
    %c0_i32_2 = arith.constant 0 : i32
    return %c0_i32, %c0_i32_0, %c0_i32_1 : i32, i32, i32
  }
  func.func @transform_2(%arg0: i32) -> (i32, i32) {
    %c0_i32 = arith.constant 0 : i32
    %c0_i32_0 = arith.constant 0 : i32
    %c0_i32_1 = arith.constant 0 : i32
    return %c0_i32, %c0_i32_0 : i32, i32
  }
  func.func @transform_3(%arg0: i32) -> (i32, i32, i32) {
    %c0_i32 = arith.constant 0 : i32
    %c0_i32_0 = arith.constant 0 : i32
    %c0_i32_1 = arith.constant 0 : i32
    return %arg0, %c0_i32, %c0_i32_0 : i32, i32, i32
  }
}

</mosaic_0001>

<bundles_post_ra>
// kernel: tpu_custom_call.1
= control target key start
LH: loop header
LB: loop body
LE: loop exit
PB: predicated region body
PF: predicated region fallthrough
CT: control target
= control target key end

     0   :  { %s1113_s14 = smov 4   ;;  %vm15_vm0 = vcmask 27648   ;;  %vm18_vm1 = vcmask 191648   ;;  %v1114_v2 = vmov 0.0   ;;  %s1237_s0 = inlined_call_operand.vmem [shape: f32[2,4,16], index: 0, kind: input, shape index: {}]   ;;  %s1238_s1 = inlined_call_operand.vmem [shape: f32[5,16,4], index: 1, kind: input, shape index: {}]   ;;  %s1239_s2 = inlined_call_operand.vmem [shape: f32[16,1], index: 2, kind: input, shape index: {}]   ;;  %s1240_s3 = inlined_call_operand.hbm [shape: f32[2,8,16], index: 3, kind: output, shape index: {}]  }
   0x1   :  { %v21_v0 = vld [vmem:[%s1237_s0] sm:$0xf]  ;;  %v22_v1 = vld [vmem:[%s1237_s0 + $0x4] sm:$0xf]  ;;  %16 = vst.msk [vmem:[#allocation2] sm:$0xf] %vm15_vm0, %v1114_v2 }
   0x2   :  { %25 = vrot.lane.b32.xlu0 %v21_v0, %s1113_s14  ;;  %17 = vst.msk [vmem:[#allocation2 + $0x4] sm:$0xf] %vm15_vm0, %v1114_v2 }
   0x3   :  { %8 = vsyncpa [#allocation4], 0  ;;  %19 = vst.msk [vmem:[#allocation2] sm:$0xf] %vm18_vm1, %v1114_v2  ;;  %v933_v3 = vld [vmem:[%s1238_s1 + $0x10] sm:$0xff]  ;;  %vm54_vm2 = vcmask 31744  }
   0x4   :  { %20 = vst.msk [vmem:[#allocation2 + $0x4] sm:$0xf] %vm18_vm1, %v1114_v2  ;;  %1005 = vmatprep.mubr.msk.f32.mxu0 %vm54_vm2, %v933_v3  ;;  %1030 = vmatprep.mubr.msk.f32.mxu1 %vm54_vm2, %v933_v3  ;;  %vm31_vm3 = vcmask 158752   ;;  %s1115_s0 = smov 124   ;;  %s1116_s19 = smov 126   ;;  %v49_v8 = vld [vmem:[%s1239_s2 + $0x8] sm:$0xff] }
   0x5   :  { %s1117_s20 = smov 122   ;;  %s1118_s21 = smov 120   ;;  %v48_v9 = vld [vmem:[%s1239_s2] sm:$0xff]  ;;  %v1119_v10 = vmov 0   ;;  %vm61_vm4 = vcmask 1043456   ;;  %v934_v12 = vld [vmem:[%s1238_s1 + $0x18] sm:$0xff] }
   0x6   :  { %27 = vrot.lane.b32.xlu0 %v22_v1, %s1113_s14  ;;  %1080 = vset.pattern.permute.xlu1 %v1119_v10  ;;  %v34_v13 = vld [vmem:[%s1238_s1] sm:$0xff]  ;;  %v35_v17 = vld [vmem:[%s1238_s1 + $0x8] sm:$0xff]  ;;  %v937_v22 = vld [vmem:[%s1238_s1 + $0x30] sm:$0xff]  ;;  %vm502_vm5 = vcmask 130048  }
   0x7   :  { %1079 = vset.pattern.permute.xlu0 %v1119_v10  ;;  %v935_v18 = vld [vmem:[%s1238_s1 + $0x20] sm:$0xff]  ;;  %v936_v21 = vld [vmem:[%s1238_s1 + $0x28] sm:$0xff]  ;;  %v938_v25 = vld [vmem:[%s1238_s1 + $0x38] sm:$0xff] }
   0x8   :  { %v939_v26 = vld [vmem:[%s1238_s1 + $0x40] sm:$0xff]  ;;  %v940_v27 = vld [vmem:[%s1238_s1 + $0x48] sm:$0xff]  ;;  %s1120_s1 = smov [#allocation3]  }
   0x9   :  { %s922_s16 = sshll.u32 %s1120_s1, 4  ;;  %s923_s16 = int_to_ptr.vmem [resolvable:$true] %s922_s16 }
   0xa   :  { %s1089_s17 = scalar_lea.vmem %s923_s16, 256  ;;  %p1094_p1 = scmp.lt.s32.totalorder %s923_s16, %s923_s16 }
   0xb   :  { %p1090_p0 = scmp.ne.s32.totalorder %s923_s16, %s1089_s17  ;;  %p1095_p2 = scmp.lt.s32.totalorder %s1089_s17, %s1089_s17 }
   0xd   :  { %p1096_p3 = por %p1095_p2, %p1094_p1 }
   0xf   :  { %p1097_p4 = pnand %p1096_p3, %p1090_p0 }
  0x74   :  { %v26_v4 = vpop.permute.xlu0 %25 }
  0x75   :  { %32 = vst.msk [vmem:[#allocation2] sm:$0xf] %vm31_vm3, %v26_v4 }
  0x78   :  { %v28_v5 = vpop.permute.xlu0 %27 }
  0x79   :  { %33 = vst.msk [vmem:[#allocation2 + $0x4] sm:$0xf] %vm31_vm3, %v28_v5 }
  0x7c   :  { %v50_v6 = vld [vmem:[#allocation2] sm:$0xf] }
  0x7d   :  { %222 = vrot.lane.b32.xlu0 %v50_v6, %s1115_s0  ;;  %52 = vrot.lane.b32.xlu1 %v50_v6, %s1116_s19 }
  0x80   :  { %v505_v7 = vld [vmem:[#allocation2 + $0x4] sm:$0xf] }
  0x81   :  { %309 = vrot.lane.b32.xlu0 %v50_v6, %s1117_s20  ;;  %507 = vrot.lane.b32.xlu1 %v505_v7, %s1116_s19 }
  0x85   :  { %396 = vrot.lane.b32.xlu0 %v50_v6, %s1118_s21  ;;  %663 = vrot.lane.b32.xlu1 %v505_v7, %s1115_s0 }
  0x89   :  { %744 = vrot.lane.b32.xlu1 %v505_v7, %s1117_s20  ;;  %490 = vperm.xlu0 %1079, %v49_v8  }
  0x8d   :  { %825 = vrot.lane.b32.xlu1 %v505_v7, %s1118_s21 }
  0x91   :  { %485 = vperm.xlu1 %1080, %v48_v9  }
  0xef   :  { %v53_v11 = vpop.permute.xlu1 %52  ;;  %v223_v14 = vpop.permute.xlu0 %222 }
  0xf0   :  { %1003 = vmatprep.subr.msk.mxu0 %vm61_vm4, %v53_v11 }
  0xf1   :  { %1004 = vmatpush3.msk.msra.mxu0 %vm61_vm4, %v53_v11 }
  0xf2   :  { %1006 = vmatmul.mubr.msk.f32.vlgmr.msra.gmra.mrb[0].mxu0 %vm54_vm2, %v934_v12  ;;  %1008 = vmatprep.subr.msk.mxu0 %vm61_vm4, %v50_v6 }
  0xf3   :  { %1009 = vmatpush3.msk.msra.mxu0 %vm61_vm4, %v50_v6  ;;  %v508_v15 = vpop.permute.xlu1 %507  ;;  %1010 = vmatprep.mubr.msk.f32.mxu0 %vm54_vm2, %v34_v13  ;;  %v310_v19 = vpop.permute.xlu0 %309 }
  0xf4   :  { %1013 = vmatprep.subr.msk.mxu0 %vm61_vm4, %v223_v14  ;;  %1028 = vmatprep.subr.msk.mxu1 %vm61_vm4, %v508_v15 }
  0xf5   :  { %1029 = vmatpush3.msk.msra.mxu1 %vm61_vm4, %v508_v15 }
  0xf6   :  { %1031 = vmatmul.mubr.msk.f32.vlgmr.msra.gmra.mrb[0].mxu1 %vm54_vm2, %v934_v12  ;;  %1033 = vmatprep.subr.msk.mxu1 %vm61_vm4, %v505_v7 }
  0xf7   :  { %1034 = vmatpush3.msk.msra.mxu1 %vm61_vm4, %v505_v7  ;;  %v664_v16 = vpop.permute.xlu1 %663  ;;  %1035 = vmatprep.mubr.msk.f32.mxu1 %vm54_vm2, %v34_v13  ;;  %v397_v23 = vpop.permute.xlu0 %396 }
  0xf8   :  { %1038 = vmatprep.subr.msk.mxu1 %vm61_vm4, %v664_v16 }
  0xfa   :  { %1011 = vmatmul.mubr.msk.f32.vlgmr.msra.gmra.mrb[0].mxu0 %vm54_vm2, %v35_v17 }
  0xfb   :  { %1014 = vmatpush3.msk.msra.mxu0 %vm61_vm4, %v223_v14  ;;  %1015 = vmatprep.mubr.msk.f32.mxu0 %vm54_vm2, %v935_v18  ;;  %v745_v20 = vpop.permute.xlu1 %744 }
  0xfc   :  { %1018 = vmatprep.subr.msk.mxu0 %vm61_vm4, %v310_v19 }
  0xfe   :  { %1036 = vmatmul.mubr.msk.f32.vlgmr.msra.gmra.mrb[0].mxu1 %vm54_vm2, %v35_v17 }
  0xff   :  { %1039 = vmatpush3.msk.msra.mxu1 %vm61_vm4, %v664_v16  ;;  %1040 = vmatprep.mubr.msk.f32.mxu1 %vm54_vm2, %v935_v18  ;;  %v826_v24 = vpop.permute.xlu1 %825 }
 0x100   :  { %1043 = vmatprep.subr.msk.mxu1 %vm61_vm4, %v745_v20 }
 0x102   :  { %1016 = vmatmul.mubr.msk.f32.vlgmr.msra.gmra.mrb[0].mxu0 %vm54_vm2, %v936_v21 }
 0x103   :  { %1019 = vmatpush3.msk.msra.mxu0 %vm61_vm4, %v310_v19  ;;  %1020 = vmatprep.mubr.msk.f32.mxu0 %vm54_vm2, %v937_v22 }
 0x104   :  { %1023 = vmatprep.subr.msk.mxu0 %vm61_vm4, %v397_v23 }
 0x106   :  { %1041 = vmatmul.mubr.msk.f32.vlgmr.msra.gmra.mrb[0].mxu1 %vm54_vm2, %v936_v21 }
 0x107   :  { %1044 = vmatpush3.msk.msra.mxu1 %vm61_vm4, %v745_v20  ;;  %1045 = vmatprep.mubr.msk.f32.mxu1 %vm54_vm2, %v937_v22 }
 0x108   :  { %1048 = vmatprep.subr.msk.mxu1 %vm61_vm4, %v826_v24  ;;  %v491_v28 = vpop.permute.xlu0 %490 }
 0x10a   :  { %1021 = vmatmul.mubr.msk.f32.vlgmr.msra.gmra.mrb[0].mxu0 %vm54_vm2, %v938_v25 }
 0x10b   :  { %1024 = vmatpush3.msk.msra.mxu0 %vm61_vm4, %v397_v23  ;;  %1025 = vmatprep.mubr.msk.f32.mxu0 %vm54_vm2, %v939_v26 }
 0x10e   :  { %1046 = vmatmul.mubr.msk.f32.vlgmr.msra.gmra.mrb[0].mxu1 %vm54_vm2, %v938_v25 }
 0x10f   :  { %1049 = vmatpush3.msk.msra.mxu1 %vm61_vm4, %v826_v24  ;;  %1050 = vmatprep.mubr.msk.f32.mxu1 %vm54_vm2, %v939_v26 }
 0x110   :  { %v486_v41 = vpop.permute.xlu1 %485 }
 0x112   :  { %1026 = vmatmul.mubr.msk.f32.vlgmr.msra.gmra.mrb[0].mxu0 %vm54_vm2, %v940_v27 }
 0x116   :  { %1051 = vmatmul.mubr.msk.f32.vlgmr.msra.gmra.mrb[0].mxu1 %vm54_vm2, %v940_v27 }
 0x1e5   :  { %v1027_v29 = vpop.f32.mrb[0].mxu0 }
 0x1e6   :  { %v494_v30 = vadd.f32 %v1027_v29, %v491_v28  ;;  %v472_v31 = vpop.f32.mrb[1].mxu0 }
 0x1e7   :  { %v493_v42 = vadd.f32 %v486_v41, %v472_v31 }
 0x1e8   :  { %v956_v32 = vmul.f32 -1.442695, %v494_v30 }
 0x1e9   :  { %v1052_v33 = vpop.f32.mrb[0].mxu1 }
 0x1ea   :  { %1081 = vpow2.f32 %v956_v32  ;;  %v907_v34 = vadd.f32 %v1052_v33, %v491_v28  ;;  %v895_v35 = vpop.f32.mrb[1].mxu1 }
 0x1eb   :  { %v906_v45 = vadd.f32 %v895_v35, %v486_v41 }
 0x1ec   :  { %v972_v36 = vmul.f32 -1.442695, %v907_v34 }
 0x1ee   :  { %1083 = vpow2.f32 %v972_v36 }
 0x1f4   :  { %v1082_v37 = vpop.eup %1081 }
 0x1f5   :  { %v498_v38 = vadd.f32 1.0, %v1082_v37 }
 0x1f7   :  { %1085 = vrcp.f32 %v498_v38 }
 0x1f8   :  { %v1084_v39 = vpop.eup %1083 }
 0x1f9   :  { %v911_v40 = vadd.f32 1.0, %v1084_v39 }
 0x1fb   :  { %1087 = vrcp.f32 %v911_v40 }
 0x201   :  { %v1086_v43 = vpop.eup %1085 }
 0x202   :  { %v501_v44 = vmul.f32 %v1086_v43, %v493_v42 }
 0x204   :  { %503 = vst.msk [vmem:[#allocation3] sm:$0xff] %vm502_vm5, %v501_v44 }
 0x205   :  { %v1088_v46 = vpop.eup %1087 }
 0x206   :  { %v914_v47 = vmul.f32 %v1088_v46, %v906_v45 }
 0x208   :  { %916 = vst.msk [vmem:[#allocation3 + $0x8] sm:$0xff] %vm502_vm5, %v914_v47 }
 0x209   :  { %1100 = shalt.err (!%p1097_p4)
}
 0x20a   :  { %s1101_s19 = scalar_lea.hbm %s1240_s3, 256 }
 0x20b   :  { %p1102_p5 = scmp.ne.s32.totalorder %s1240_s3, %s1101_s19  ;;  %p1105_p6 = scmp.lt.u32.totalorder %s1101_s19, %s1240_s3 }
 0x20d   :  { %p1107_p7 = pnand %p1105_p6, %p1102_p5 }
 0x20f   :  { %1110 = shalt.err (!%p1107_p7)
}
 0x210   :  { %s1121_s24 = smov 128   ;;  %s1122_s25 = smov 8  }
 0x211   :  { %928 = dma.vmem_to_hbm [thread:$0]  %s923_s16, 256, %s1240_s3, [#allocation4], %s1121_s24, %s1121_s24, %s1122_s25  }
 0x212   :  { %1111 = dma.done.wait [#allocation4], 256  }
 0x213   :  { %1112 = vsyncadd [#allocation4], 4294967040 }
 0x214   :  { %932 = vsyncpa [#allocation4], 1 }

</bundles_post_ra>
